<compile_context>
chip_gen: v7x
topology: tpu7x:2x2x1
jax: 0.10.0
libtpu: 0.0.40
codegen_flags: <defaults>
</compile_context>

<pallas_src>
import jax
import jax.numpy as jnp
from jax.experimental import pallas as pl
from jax.experimental.pallas import tpu as pltpu


def _round_up(a, b):
    return ((a + b - 1) // b) * b


def _gated_conv1x1_kernel(w_ref, x_ref, o_ref):
    # One MXU matmul per grid step: (C_out, C_in) @ (C_in, Tp) -> (C_out, Tp)
    # with a lane-dense (multiple-of-128) store and f32 accumulation.
    o_ref[...] = jnp.dot(
        w_ref[...], x_ref[...], preferred_element_type=jnp.float32
    ).astype(o_ref.dtype)


def downsample_c(x, weight, mask, stride, *, target_block_bytes=4 * 1024 * 1024):
    """DownsampleC.forward: 1x1 strided gated conv (no bias), NCHW layout."""
    N, C_in, H, W = x.shape
    C_out = weight.shape[0]
    assert weight.shape == (C_out, C_in, 1, 1)
    assert mask.shape == weight.shape

    # Conv output size with kernel_size=1, padding=0.
    H_out = (H - 1) // stride + 1
    W_out = (W - 1) // stride + 1
    P = H_out * W_out
    L = N * P

    # Fold the constant (ones) mask into the weight — grid-invariant.
    w_eff = (weight * mask).reshape(C_out, C_in).astype(x.dtype)

    # Strided slice + transpose + flatten in the wrapper (fuses into the copy
    # XLA already has to make), so the kernel sees one contiguous, lane-dense
    # (C_in, N*P) slab and never DMAs rows/cols it would throw away.
    x2 = (
        x[:, :, ::stride, ::stride]
        .reshape(N, C_in, P)
        .transpose(1, 0, 2)
        .reshape(C_in, L)
    )

    # --- Tile selection: memory-bound, so maximize block size within VMEM ---
    lane = 128
    itemsize = jnp.dtype(x.dtype).itemsize
    sublane = {4: 8, 2: 16, 1: 32}.get(itemsize, 8)
    # Bytes per output column, with channel dims rounded up to the sublane tile
    # (a (4, Tp) f32 tile physically occupies (8, Tp) in VMEM).
    per_col = (_round_up(C_in, sublane) + _round_up(C_out, sublane)) * itemsize

    L128 = _round_up(L, lane)
    tp = max(lane, (target_block_bytes // per_col) // lane * lane)
    if tp >= 512:
        tp = (tp // 512) * 512                    # prefer multiples of 512
    if L128 >= 2 * lane:
        # Keep the grid length >= 2 so v7x's two TensorCores both get work.
        tp = min(tp, _round_up(pl.cdiv(L128, 2), lane))
    tp = min(tp, L128)
    L_pad = _round_up(L128, tp)
    grid = (L_pad // tp,)

    if L_pad != L:
        x2 = jnp.pad(x2, ((0, 0), (0, L_pad - L)))

    # Explicit VMEM limit: double-buffered in+out blocks + padded weight + headroom.
    block_bytes = per_col * tp
    w_bytes = _round_up(C_out, sublane) * _round_up(C_in, lane) * itemsize
    vmem_limit = min(max(2 * block_bytes + 2 * w_bytes + (4 << 20), 16 << 20), 48 << 20)

    flops = 2 * C_out * C_in * L_pad
    bytes_accessed = (
        C_in * L_pad * itemsize        # activations read
        + C_out * C_in * itemsize      # folded weight read
        + C_out * L_pad * itemsize     # output written
    )

    out2 = pl.pallas_call(
        _gated_conv1x1_kernel,
        out_shape=jax.ShapeDtypeStruct((C_out, L_pad), x.dtype),
        grid=grid,
        in_specs=[
            pl.BlockSpec((C_out, C_in), lambda i: (0, 0)),   # folded weight
            pl.BlockSpec((C_in, tp), lambda i: (0, i)),      # activations
        ],
        out_specs=pl.BlockSpec((C_out, tp), lambda i: (0, i)),
        compiler_params=pltpu.CompilerParams(
            dimension_semantics=("parallel",),
            vmem_limit_bytes=vmem_limit,
        ),
        cost_estimate=pl.CostEstimate(
            flops=flops, transcendentals=0, bytes_accessed=bytes_accessed
        ),
    )(w_eff, x2)

    # Back to NCHW (wrapper-side layout plumbing only; a consumer that accepts
    # the (C_out, N*P) slab could skip this transpose entirely).
    out = (
        out2[:, :L]
        .reshape(C_out, N, H_out, W_out)
        .transpose(1, 0, 2, 3)
    )
    return out


if __name__ == "__main__":
    key = jax.random.PRNGKey(0)
    k_x, k_w = jax.random.split(key)

    # Small shapes consistent with the module: nIn=4 -> nOut=8, stride=2.
    N, C_in, H, W = 2, 4, 16, 16
    C_out, stride = 8, 2

    x = jax.random.normal(k_x, (N, C_in, H, W), dtype=jnp.float32)
    weight = jax.random.normal(k_w, (C_out, C_in, 1, 1), dtype=jnp.float32) * 0.1
    mask = jnp.ones((C_out, C_in, 1, 1), dtype=jnp.float32)   # GatedConv2d mask

    out = downsample_c(x, weight, mask, stride)
    out = jax.block_until_ready(out)

    # Pure-JAX reference of the PyTorch forward (1x1 strided conv, no bias),
    # computed at HIGHEST precision.  The kernel uses default MXU precision
    # (bf16 passes, f32 accumulation), so the tolerance is loosened accordingly.
    w_ref = (weight * mask).reshape(C_out, C_in)
    ref = jnp.einsum(
        "oi,nihw->nohw",
        w_ref,
        x[:, :, ::stride, ::stride],
        precision=jax.lax.Precision.HIGHEST,
    )

    H_out = (H - 1) // stride + 1
    W_out = (W - 1) // stride + 1
    assert out.shape == (N, C_out, H_out, W_out), out.shape
    assert out.dtype == x.dtype
    assert jnp.allclose(out, ref, atol=1e-2, rtol=1e-2), "mismatch vs reference"

    print("KERNEL_OK")
</pallas_src>

<mosaic_0001>
module attributes {stable_mosaic.version = 11 : i64} {
  func.func @_gated_conv1x1_kernel(%arg0: i32, %arg1: memref<8x4xf32, #tpu.memory_space<vmem>>, %arg2: memref<4x128xf32, #tpu.memory_space<vmem>>, %arg3: memref<8x128xf32, #tpu.memory_space<vmem>>) attributes {dimension_semantics = [#tpu.dimension_semantics<parallel>], iteration_bounds = array<i64: 1>, scalar_prefetch = 0 : i64, scratch_operands = 0 : i64, tpu.core_type = #tpu.core_type<tc>, window_params = [{pipeline_mode = #tpu.pipeline_mode<synchronous>, transform_indices = @transform_0, window_bounds = array<i64: 8, 4>}, {transform_indices = @transform_1, window_bounds = array<i64: 4, 128>}, {transform_indices = @transform_2, window_bounds = array<i64: 8, 128>}]} {
    %c0 = arith.constant 0 : index
    %c0_0 = arith.constant 0 : index
    %0 = vector.load %arg1[%c0, %c0_0] : memref<8x4xf32, #tpu.memory_space<vmem>>, vector<8x4xf32>
    %c0_1 = arith.constant 0 : index
    %c0_2 = arith.constant 0 : index
    %1 = vector.load %arg2[%c0_1, %c0_2] : memref<4x128xf32, #tpu.memory_space<vmem>>, vector<4x128xf32>
    %cst = arith.constant dense<0.000000e+00> : vector<8x128xf32>
    %2 = tpu.matmul %0, %1, %cst {dimension_numbers = #tpu.dot_dimension_numbers<[1], [0], [0], [1], [0, 0, 1, 1], [], []>} : vector<8x4xf32>, vector<4x128xf32>, vector<8x128xf32> -> vector<8x128xf32>
    %c0_3 = arith.constant 0 : index
    %c0_4 = arith.constant 0 : index
    %3 = vector.load %arg3[%c0_3, %c0_4] : memref<8x128xf32, #tpu.memory_space<vmem>>, vector<8x128xf32>
    tpu.vector_store %arg3[%c0_3, %c0_4], %2 {strides = array<i32>} : memref<8x128xf32, #tpu.memory_space<vmem>>, vector<8x128xf32>,
    return
  }
  func.func @transform_0(%arg0: i32) -> (i32, i32) {
    %c0_i32 = arith.constant 0 : i32
    %c0_i32_0 = arith.constant 0 : i32
    %c0_i32_1 = arith.constant 0 : i32
    return %c0_i32, %c0_i32_0 : i32, i32
  }
  func.func @transform_1(%arg0: i32) -> (i32, i32) {
    %c0_i32 = arith.constant 0 : i32
    %c0_i32_0 = arith.constant 0 : i32
    return %c0_i32, %arg0 : i32, i32
  }
  func.func @transform_2(%arg0: i32) -> (i32, i32) {
    %c0_i32 = arith.constant 0 : i32
    %c0_i32_0 = arith.constant 0 : i32
    return %c0_i32, %arg0 : i32, i32
  }
}

</mosaic_0001>

<bundles_post_ra>
// kernel: tpu_custom_call.1
= control target key start
LH: loop header
LB: loop body
LE: loop exit
PB: predicated region body
PF: predicated region fallthrough
CT: control target
= control target key end

     0   :  { %vm18_vm0 = vcmask 1043456   ;;  %v143_v2 = vmov 0.0   ;;  %vm144_vm1 = vmmov 0   ;;  %vm14_vm2 = vcmask 31744   ;;  %s179_s0 = inlined_call_operand.vmem [shape: f32[8,4], index: 0, kind: input, shape index: {}]   ;;  %s180_s1 = inlined_call_operand.vmem [shape: f32[4,128], index: 1, kind: input, shape index: {}]   ;;  %s181_s2 = inlined_call_operand.hbm [shape: f32[8,128], index: 2, kind: output, shape index: {}]  }
   0x1   :  { %v13_v0 = vld [vmem:[%s180_s1] sm:$0xf]  ;;  %111 = vmatprep.subr.mxu0 %v143_v2  ;;  %113 = vmatprep.mubr.msk.f32.mxu0 %vm144_vm1, %v143_v2 }
   0x2   :  { %v12_v1 = vld [vmem:[%s179_s0] sm:$0xff] }
   0x3   :  { %7 = vsyncpa [#allocation3], 0  ;;  %112 = vmatpush3.msk.msra.mxu0 %vm18_vm0, %v13_v0  ;;  %s145_s13 = smov [#allocation2]  }
   0x4   :  { %114 = vmatmul.mubr.msk.f32.vlgmr.msra.gmra.mrb[0].mxu0 %vm14_vm2, %v12_v1  ;;  %s99_s14 = sshll.u32 %s145_s13, 4  ;;  %s100_s14 = int_to_ptr.vmem [resolvable:$true] %s99_s14 }
   0x5   :  { %s119_s1 = scalar_lea.vmem %s100_s14, 128  ;;  %p124_p1 = scmp.lt.s32.totalorder %s100_s14, %s100_s14 }
   0x6   :  { %p120_p0 = scmp.ne.s32.totalorder %s100_s14, %s119_s1  ;;  %p125_p2 = scmp.lt.s32.totalorder %s119_s1, %s119_s1 }
   0x8   :  { %p126_p3 = por %p125_p2, %p124_p1 }
   0xa   :  { %p127_p4 = pnand %p126_p3, %p120_p0 }
  0xd7   :  { %v88_v3 = vpop.f32.mrb[0].mxu0 }
  0xd8   :  { %92 = vst [vmem:[#allocation2] sm:$0xff] %v88_v3  ;;  %v115_v4 = vpop.f32.mrb[1].mxu0 }
  0xd9   :  { %130 = shalt.err (!%p127_p4)
}
  0xda   :  { %s131_s16 = scalar_lea.hbm %s181_s2, 128 }
  0xdb   :  { %p132_p5 = scmp.ne.s32.totalorder %s181_s2, %s131_s16  ;;  %p135_p6 = scmp.lt.u32.totalorder %s131_s16, %s181_s2 }
  0xdd   :  { %p137_p7 = pnand %p135_p6, %p132_p5 }
  0xdf   :  { %140 = shalt.err (!%p137_p7)
}
  0xe0   :  { %102 = dma.vmem_to_hbm [thread:$0]  %s100_s14, 128, %s181_s2, [#allocation3]  }
  0xe1   :  { %141 = dma.done.wait [#allocation3], 128  }
  0xe2   :  { %142 = vsyncadd [#allocation3], 4294967168 }
  0xe3   :  { %106 = vsyncpa [#allocation3], 1 }

</bundles_post_ra>
